<compile_context>
chip_gen: v6e
topology: v6e:2x2x1
jax: 0.10.0
libtpu: 0.0.40
codegen_flags: <defaults>
</compile_context>

<pallas_src>
import jax
import jax.numpy as jnp
from jax.experimental import pallas as pl
from jax.experimental.pallas import tpu as pltpu

_HIDDEN = 64
_OUT = 2


def _policy_kernel(x_ref, p_ref, b2_ref, out_ref):
    # x_ref:   (B, 1)   f32, VMEM
    # p_ref:   (8, 64)  f32, VMEM packed parameter slab:
    #            row 0 -> w1 (Linear(1,64).weight column)
    #            row 1 -> b1
    #            row 2 -> w2[0, :] (output-0 weights)
    #            row 3 -> w2[1, :] (output-1 weights)
    #            rows 4..7 -> zero padding (sublane multiple)
    # b2_ref:  (2,)     f32, SMEM scalars (output biases)
    # out_ref: (B, 2)   f32, VMEM
    x = x_ref[...]                                   # (B, 1)

    w1 = p_ref[0:1, :]                               # (1, 64)
    b1 = p_ref[1:2, :]                               # (1, 64)
    w2a = p_ref[2:3, :]                              # (1, 64)
    w2b = p_ref[3:4, :]                              # (1, 64)

    # Layer 1: Linear(1, 64) + ReLU as a VPU broadcast outer product (no MXU).
    h = jnp.maximum(x * w1 + b1, 0.0)                # (B, 64)

    # Layer 2: Linear(64, 2) as two lane (XLU) reductions; bias folded into each
    # epilogue as a cheap SMEM scalar splat (no 2-lane masked load, no concat).
    y0 = jnp.sum(h * w2a, axis=-1, keepdims=True) + b2_ref[0]   # (B, 1)
    y1 = jnp.sum(h * w2b, axis=-1, keepdims=True) + b2_ref[1]   # (B, 1)

    # sigmoid(y) == 0.5 * (tanh(0.5 * y) + 1): single EUP op per column.
    out_ref[:, 0:1] = 0.5 * (jnp.tanh(0.5 * y0) + 1.0)
    out_ref[:, 1:2] = 0.5 * (jnp.tanh(0.5 * y1) + 1.0)


def pack_params(w1, b1, w2, b2):
    """Pack PyTorch-layout params ONCE at parameter-load time.

    Returns (slab (8, 64) f32, b2 (2,) f32). Params are static across DRL forward
    calls, so this never runs in the per-step hot path.
    """
    assert w1.shape == (_HIDDEN, 1), w1.shape
    assert b1.shape == (_HIDDEN,), b1.shape
    assert w2.shape == (_OUT, _HIDDEN), w2.shape
    assert b2.shape == (_OUT,), b2.shape
    rows = jnp.stack(
        [w1.reshape(_HIDDEN), b1.reshape(_HIDDEN), w2[0, :], w2[1, :]], axis=0
    ).astype(jnp.float32)                                  # (4, 64)
    slab = jnp.pad(rows, ((0, 4), (0, 0)))                 # (8, 64): sublane multiple
    return slab, b2.astype(jnp.float32)


@jax.jit
def policy_network_forward(x, slab, b2):
    """x: (B, 1) f32.  slab/b2: outputs of pack_params (pre-packed, resident)."""
    B = x.shape[0]
    vmem = pl.BlockSpec(memory_space=pltpu.MemorySpace.VMEM)
    smem = pl.BlockSpec(memory_space=pltpu.MemorySpace.SMEM)
    cost = pl.CostEstimate(
        flops=6 * B * _HIDDEN,        # outer product + ReLU + 2 dot-reductions (~tiny)
        transcendentals=_OUT * B,     # tanh-based sigmoid
        bytes_accessed=(B * 1 + 8 * _HIDDEN + _OUT + B * _OUT) * 4,
    )
    return pl.pallas_call(
        _policy_kernel,
        out_shape=jax.ShapeDtypeStruct((B, _OUT), jnp.float32),
        in_specs=[vmem, vmem, smem],
        out_specs=vmem,
        cost_estimate=cost,
    )(x, slab, b2)


def _reference_forward(x, w1, b1, w2, b2):
    h = jnp.maximum(x @ w1.T + b1, 0.0)
    return jax.nn.sigmoid(h @ w2.T + b2)


if __name__ == "__main__":
    key = jax.random.PRNGKey(0)
    k_x, k_w1, k_b1, k_w2, k_b2 = jax.random.split(key, 5)

    B = 8  # small batch of greenhouse states
    x = jax.random.normal(k_x, (B, 1), dtype=jnp.float32)

    # Deterministic parameter init (uniform, PyTorch-Linear-like bounds).
    w1 = jax.random.uniform(k_w1, (_HIDDEN, 1), jnp.float32, -1.0, 1.0)        # 1/sqrt(1)
    b1 = jax.random.uniform(k_b1, (_HIDDEN,), jnp.float32, -1.0, 1.0)
    w2 = jax.random.uniform(k_w2, (_OUT, _HIDDEN), jnp.float32, -0.125, 0.125)  # 1/sqrt(64)
    b2 = jax.random.uniform(k_b2, (_OUT,), jnp.float32, -0.125, 0.125)

    # Pack once (parameter-load time), reuse across every forward call.
    slab, b2_packed = pack_params(w1, b1, w2, b2)

    out = policy_network_forward(x, slab, b2_packed)
    out = jax.block_until_ready(out)

    ref = _reference_forward(x, w1, b1, w2, b2)
    assert out.shape == (B, _OUT)
    assert jnp.allclose(out, ref, atol=1e-5, rtol=1e-5), "mismatch vs reference"

    print("KERNEL_OK")
</pallas_src>

<mosaic_0001>
module attributes {stable_mosaic.version = 11 : i64} {
  func.func @_policy_kernel(%arg0: memref<8x1xf32, #tpu.memory_space<vmem>>, %arg1: memref<8x64xf32, #tpu.memory_space<vmem>>, %arg2: memref<2xf32, #tpu.memory_space<smem>>, %arg3: memref<8x2xf32, #tpu.memory_space<vmem>>) attributes {dimension_semantics = [], scalar_prefetch = 0 : i64, scratch_operands = 0 : i64, tpu.core_type = #tpu.core_type<tc>} {
    %c0 = arith.constant 0 : index
    %c0_0 = arith.constant 0 : index
    %0 = vector.load %arg0[%c0, %c0_0] : memref<8x1xf32, #tpu.memory_space<vmem>>, vector<8x1xf32>
    %c0_1 = arith.constant 0 : index
    %c0_2 = arith.constant 0 : index
    %1 = vector.load %arg1[%c0_1, %c0_2] : memref<8x64xf32, #tpu.memory_space<vmem>>, vector<1x64xf32>
    %c1 = arith.constant 1 : index
    %c0_3 = arith.constant 0 : index
    %2 = vector.load %arg1[%c1, %c0_3] : memref<8x64xf32, #tpu.memory_space<vmem>>, vector<1x64xf32>
    %c2 = arith.constant 2 : index
    %c0_4 = arith.constant 0 : index
    %3 = vector.load %arg1[%c2, %c0_4] : memref<8x64xf32, #tpu.memory_space<vmem>>, vector<1x64xf32>
    %c3 = arith.constant 3 : index
    %c0_5 = arith.constant 0 : index
    %4 = vector.load %arg1[%c3, %c0_5] : memref<8x64xf32, #tpu.memory_space<vmem>>, vector<1x64xf32>
    %5 = vector.broadcast %0 : vector<8x1xf32> to vector<8x64xf32>
    %6 = vector.broadcast %1 : vector<1x64xf32> to vector<8x64xf32>
    %7 = arith.mulf %5, %6 : vector<8x64xf32>
    %8 = vector.broadcast %2 : vector<1x64xf32> to vector<8x64xf32>
    %9 = arith.addf %7, %8 : vector<8x64xf32>
    %cst = arith.constant 0.000000e+00 : f32
    %10 = vector.broadcast %cst : f32 to vector<8x64xf32>
    %11 = arith.maximumf %9, %10 : vector<8x64xf32>
    %12 = vector.broadcast %3 : vector<1x64xf32> to vector<8x64xf32>
    %13 = arith.mulf %11, %12 : vector<8x64xf32>
    %cst_6 = arith.constant dense<0.000000e+00> : vector<8xf32>
    %14 = vector.multi_reduction <add>, %13, %cst_6 [1] : vector<8x64xf32> to vector<8xf32>
    %15 = vector.shape_cast %14 : vector<8xf32> to vector<8x1xf32>
    %c0_7 = arith.constant 0 : index
    %16 = memref.load %arg2[%c0_7] : memref<2xf32, #tpu.memory_space<smem>>
    %17 = vector.broadcast %16 : f32 to vector<8x1xf32>
    %18 = arith.addf %15, %17 : vector<8x1xf32>
    %19 = vector.broadcast %4 : vector<1x64xf32> to vector<8x64xf32>
    %20 = arith.mulf %11, %19 : vector<8x64xf32>
    %cst_8 = arith.constant dense<0.000000e+00> : vector<8xf32>
    %21 = vector.multi_reduction <add>, %20, %cst_8 [1] : vector<8x64xf32> to vector<8xf32>
    %22 = vector.shape_cast %21 : vector<8xf32> to vector<8x1xf32>
    %c1_9 = arith.constant 1 : index
    %23 = memref.load %arg2[%c1_9] : memref<2xf32, #tpu.memory_space<smem>>
    %24 = vector.broadcast %23 : f32 to vector<8x1xf32>
    %25 = arith.addf %22, %24 : vector<8x1xf32>
    %cst_10 = arith.constant 5.000000e-01 : f32
    %26 = vector.broadcast %cst_10 : f32 to vector<8x1xf32>
    %27 = arith.mulf %26, %18 : vector<8x1xf32>
    %28 = math.tanh %27 : vector<8x1xf32>
    %cst_11 = arith.constant 1.000000e+00 : f32
    %29 = vector.broadcast %cst_11 : f32 to vector<8x1xf32>
    %30 = arith.addf %28, %29 : vector<8x1xf32>
    %cst_12 = arith.constant 5.000000e-01 : f32
    %31 = vector.broadcast %cst_12 : f32 to vector<8x1xf32>
    %32 = arith.mulf %31, %30 : vector<8x1xf32>
    %c0_13 = arith.constant 0 : index
    %c0_14 = arith.constant 0 : index
    %33 = vector.load %arg3[%c0_13, %c0_14] : memref<8x2xf32, #tpu.memory_space<vmem>>, vector<8x1xf32>
    tpu.vector_store %arg3[%c0_13, %c0_14], %32 {strides = array<i32>} : memref<8x2xf32, #tpu.memory_space<vmem>>, vector<8x1xf32>,
    %cst_15 = arith.constant 5.000000e-01 : f32
    %34 = vector.broadcast %cst_15 : f32 to vector<8x1xf32>
    %35 = arith.mulf %34, %25 : vector<8x1xf32>
    %36 = math.tanh %35 : vector<8x1xf32>
    %cst_16 = arith.constant 1.000000e+00 : f32
    %37 = vector.broadcast %cst_16 : f32 to vector<8x1xf32>
    %38 = arith.addf %36, %37 : vector<8x1xf32>
    %cst_17 = arith.constant 5.000000e-01 : f32
    %39 = vector.broadcast %cst_17 : f32 to vector<8x1xf32>
    %40 = arith.mulf %39, %38 : vector<8x1xf32>
    %c0_18 = arith.constant 0 : index
    %c1_19 = arith.constant 1 : index
    %41 = vector.load %arg3[%c0_18, %c1_19] : memref<8x2xf32, #tpu.memory_space<vmem>>, vector<8x1xf32>
    tpu.vector_store %arg3[%c0_18, %c1_19], %40 {strides = array<i32>} : memref<8x2xf32, #tpu.memory_space<vmem>>, vector<8x1xf32>,
    return
  }
}

</mosaic_0001>

<bundles_post_ra>
// kernel: policy_network_forward.1
= control target key start
LH: loop header
LB: loop body
LE: loop exit
PB: predicated region body
PF: predicated region fallthrough
CT: control target
= control target key end

     0   :  { %8 = vsyncpa [#allocation3], 0  ;;  %s160_s0 = inlined_call_operand.vmem [shape: f32[8,1], index: 0, kind: input, shape index: {}]   ;;  %s161_s1 = inlined_call_operand.vmem [shape: f32[8,64], index: 1, kind: input, shape index: {}]   ;;  %s162_s2 = inlined_call_operand.vmem [shape: f32[2], index: 2, kind: input, shape index: {}]   ;;  %s163_s3 = inlined_call_operand.vmem [shape: f32[8,2], index: 3, kind: output, shape index: {}]  }
   0x1   :  { %s19_s14 = sshll.u32 %s162_s2, 4  ;;  %s20_s14 = int_to_ptr.vmem [resolvable:$true] %s19_s14 }
   0x2   :  { %s100_s15 = scalar_lea.vmem %s20_s14, 16  ;;  %p105_p1 = scmp.lt.s32.totalorder %s20_s14, %s20_s14 }
   0x3   :  { %p101_p0 = scmp.ne.s32.totalorder %s20_s14, %s100_s15  ;;  %p106_p2 = scmp.lt.s32.totalorder %s100_s15, %s100_s15 }
   0x5   :  { %p107_p3 = por %p106_p2, %p105_p1 }
   0x7   :  { %p108_p4 = pnand %p107_p3, %p101_p0 }
   0x9   :  { %111 = shalt.err (!%p108_p4)
}
   0xa   :  { %s114_s16 = smov [#allocation2]  }
   0xb   :  { %22 = dma.vmem_to_smem %s20_s14, 16, %s114_s16, [#allocation3]  }
   0xc   :  { %112 = dma.done.wait [#allocation3], 16  }
   0xd   :  { %113 = vsyncadd [#allocation3], 4294967280 }
   0xe   :  { %26 = sfence }
   0xf   :  { %v27_v0 = vld [vmem:[%s160_s0] sm:$0xff]  ;;  %v115_v1 = vmov 0   ;;  %vm53_vm0 = vcmask 523264   ;;  %s92_s25 = sld [smem:[#allocation2 + $0x1]]  ;;  %vm75_vm1 = vcmask 7168   ;;  %vm81_vm2 = vcmask 15368  }
  0x10   :  { %95 = vset.pattern.permute.xlu0 %v115_v1  ;;  %v88_v2 = vld [vmem:[%s161_s1] ss:$0 sm:$0xff]  ;;  %v89_v3 = vld [vmem:[%s161_s1 + $0x1] ss:$0 sm:$0xff]  ;;  %v91_v7 = vld [vmem:[%s161_s1 + $0x3] ss:$0 sm:$0xff] }
  0x11   :  { %34 = vperm.xlu0 %95, %v27_v0   ;;  %v90_v8 = vld [vmem:[%s161_s1 + $0x2] ss:$0 sm:$0xff]  ;;  %s57_s26 = sld [smem:[#allocation2]] }
  0x15   :  { %v69_v14 = vstv %s92_s25 }
  0x17   :  { %v58_v15 = vstv %s57_s26 }
  0x8c   :  { %v35_v4 = vpop.permute.xlu0 %34 }
  0x8d   :  { %v41_v5 = vmul.f32 %v88_v2, %v35_v4 }
  0x8f   :  { %v46_v6 = vadd.f32 %v89_v3, %v41_v5 }
  0x91   :  { %v47_v9 = vmax.f32 %v46_v6, 0.0 }
  0x93   :  { %v64_v10 = vmul.f32 %v91_v7, %v47_v9  ;;  %v52_v11 = vmul.f32 %v90_v8, %v47_v9 }
  0x95   :  { %v65_v12 = vsel %vm53_vm0, %v64_v10, 0.0  ;;  %v54_v13 = vsel %vm53_vm0, %v52_v11, 0.0 }
  0x96   :  { %66 = vadd.xlane.f32.xlu1 %v65_v12  ;;  %55 = vadd.xlane.f32.xlu0 %v54_v13 }
 0x11f   :  { %v67_v16 = vpop.xlane.xlu1 %66  ;;  %v56_v17 = vpop.xlane.xlu0 %55 }
 0x120   :  { %v70_v18 = vadd.f32 %v69_v14, %v67_v16  ;;  %v59_v19 = vadd.f32 %v58_v15, %v56_v17 }
 0x122   :  { %v77_v20 = vmul.f32 0.5, %v70_v18  ;;  %v71_v21 = vmul.f32 0.5, %v59_v19 }
 0x124   :  { %96 = vtanh.f32 %v77_v20 }
 0x125   :  { %98 = vtanh.f32 %v71_v21 }
 0x131   :  { %v97_v22 = vpop.eup %96 }
 0x132   :  { %v99_v23 = vpop.eup %98  ;;  %v79_v24 = vadd.f32 1.0, %v97_v22 }
 0x133   :  { %v73_v25 = vadd.f32 1.0, %v99_v23 }
 0x134   :  { %v80_v26 = vmul.f32 0.5, %v79_v24 }
 0x135   :  { %v74_v27 = vmul.f32 0.5, %v73_v25 }
 0x137   :  { %76 = vst.msk [vmem:[%s163_s3] sm:$0xff] %vm75_vm1, %v74_v27 }
 0x138   :  { %82 = vst.msk [vmem:[%s163_s3] sm:$0xff] %vm81_vm2, %v80_v26 }
 0x139   :  { %87 = vsyncpa [#allocation3], 1 }

</bundles_post_ra>
